<compile_context>
chip_gen: v6e
topology: v6e:2x2x1
jax: 0.10.0
libtpu: 0.0.40
codegen_flags: <defaults>
</compile_context>

<pallas_src>
import jax
import jax.numpy as jnp
from jax.experimental import pallas as pl
from jax.experimental.pallas import tpu as pltpu

_TB_MAX = 8192  # batch-tile (lane) width; multiple of 128, tiny VMEM footprint


def _round_up(n, m):
    return ((n + m - 1) // m) * m


def _dense_fma(w_ref, b_ref, h):
    """y = W @ h + b with batch on lanes, as unrolled VPU broadcast-FMAs.

    w_ref: [n_out, n_in] (torch layout), b_ref: [n_out, 1], h: [n_in, TB] f32.
    Returns [n_out, TB] f32.
    """
    w = w_ref[...].astype(jnp.float32)
    b = b_ref[...].astype(jnp.float32)
    n_out, n_in = w.shape
    tb = h.shape[1]
    acc = jnp.broadcast_to(b, (n_out, tb))            # hoisted bias broadcast
    for k in range(n_in):                             # tiny static unroll (<=8)
        acc = acc + w[:, k:k + 1] * h[k:k + 1, :]     # [n_out,1]*[1,TB] FMA
    return acc


def _value_net_kernel(xT_ref, w1_ref, b1_ref, w2_ref, b2_ref, w3_ref, b3_ref,
                      o_ref):
    x = xT_ref[...].astype(jnp.float32)               # [6, TB], batch on lanes
    h1 = jnp.tanh(_dense_fma(w1_ref, b1_ref, x))      # [8, TB]
    h2 = jnp.tanh(_dense_fma(w2_ref, b2_ref, h1))     # [4, TB]
    out = _dense_fma(w3_ref, b3_ref, h2)              # [1, TB] lane-dense
    o_ref[...] = out.astype(o_ref.dtype)


def value_net_forward(x, params):
    """Forward pass of valueNet.

    x: array of shape [..., 6] (or [6]); flattened to [-1, 6] like the torch code.
    params: dict with torch-layout weights: w1 [8,6], b1 [8], w2 [4,8], b2 [4],
            w3 [1,4], b3 [1].
    Returns: float32 array of shape [B, 1].
    """
    x = jnp.asarray(x)
    if not jnp.issubdtype(x.dtype, jnp.floating):
        x = x.astype(jnp.float32)                     # torch's x.float()
    if x.ndim == 1:
        x = x[None, :]
    x = x.reshape(x.shape[0], -1)                     # view(-1, num_flat_features)
    B, F = x.shape

    # Lane-dense layout: put the batch on the 128-lane axis.
    b_pad = _round_up(max(B, 1), 128)
    tb = min(_TB_MAX, b_pad)
    xT = jnp.pad(x, ((0, b_pad - B), (0, 0))).T       # [F, b_pad]

    f32 = jnp.float32
    w1 = params["w1"].astype(f32)
    b1 = params["b1"].astype(f32).reshape(-1, 1)      # [8,1] column for batch-on-lanes
    w2 = params["w2"].astype(f32)
    b2 = params["b2"].astype(f32).reshape(-1, 1)
    w3 = params["w3"].astype(f32)
    b3 = params["b3"].astype(f32).reshape(-1, 1)

    grid = (pl.cdiv(b_pad, tb),)
    x_bytes = F * x.dtype.itemsize
    param_bytes = sum(int(a.size) * 4 for a in (w1, b1, w2, b2, w3, b3))

    out = pl.pallas_call(
        _value_net_kernel,
        out_shape=jax.ShapeDtypeStruct((1, b_pad), jnp.float32),
        grid=grid,
        in_specs=[
            pl.BlockSpec((F, tb), lambda i: (0, i)),          # x^T tile, batch on lanes
            pl.BlockSpec(w1.shape, lambda i: (0, 0)),          # weights stay resident
            pl.BlockSpec(b1.shape, lambda i: (0, 0)),
            pl.BlockSpec(w2.shape, lambda i: (0, 0)),
            pl.BlockSpec(b2.shape, lambda i: (0, 0)),
            pl.BlockSpec(w3.shape, lambda i: (0, 0)),
            pl.BlockSpec(b3.shape, lambda i: (0, 0)),
        ],
        out_specs=pl.BlockSpec((1, tb), lambda i: (0, i)),     # lane-dense output tile
        compiler_params=pltpu.CompilerParams(
            dimension_semantics=("parallel",),                  # megacore on v7x
        ),
        cost_estimate=pl.CostEstimate(
            flops=int(2 * (6 * 8 + 8 * 4 + 4 * 1) * b_pad),     # 168 flops/row
            transcendentals=int(12 * b_pad),                    # 8+4 tanh/row
            bytes_accessed=int((x_bytes + 4) * b_pad + param_bytes),
        ),
    )(xT, w1, b1, w2, b2, w3, b3)

    return out[:, :B].T                                         # [B, 1]


def init_params(key):
    """Deterministic init mimicking torch.nn.Linear default (U[-1/sqrt(fan_in), +])."""
    def linear(key, fan_in, fan_out):
        kw, kb = jax.random.split(key)
        bound = 1.0 / jnp.sqrt(jnp.float32(fan_in))
        w = jax.random.uniform(kw, (fan_out, fan_in), jnp.float32, -bound, bound)
        b = jax.random.uniform(kb, (fan_out,), jnp.float32, -bound, bound)
        return w, b

    k1, k2, k3 = jax.random.split(key, 3)
    w1, b1 = linear(k1, 6, 8)
    w2, b2 = linear(k2, 8, 4)
    w3, b3 = linear(k3, 4, 1)
    return {"w1": w1, "b1": b1, "w2": w2, "b2": b2, "w3": w3, "b3": b3}


def _reference_forward(x, params):
    x = jnp.asarray(x, jnp.float32)
    if x.ndim == 1:
        x = x[None, :]
    x = x.reshape(x.shape[0], -1)
    h = jnp.tanh(x @ params["w1"].T + params["b1"])
    h = jnp.tanh(h @ params["w2"].T + params["b2"])
    return h @ params["w3"].T + params["b3"]


if __name__ == "__main__":
    key = jax.random.PRNGKey(0)
    pkey, xkey, xkey2 = jax.random.split(key, 3)
    params = init_params(pkey)

    # Small batched input (matches torch forward on a [B, 6] state batch).
    batch = 8
    x = jax.random.normal(xkey, (batch, 6), dtype=jnp.float32)
    out = jax.block_until_ready(value_net_forward(x, params))
    ref = _reference_forward(x, params)
    assert out.shape == (batch, 1)
    assert jnp.allclose(out, ref, atol=1e-5, rtol=1e-5)

    # Non-128-aligned batch exercises the padding path.
    x2 = jax.random.normal(xkey2, (300, 6), dtype=jnp.float32)
    out2 = jax.block_until_ready(value_net_forward(x2, params))
    assert out2.shape == (300, 1)
    assert jnp.allclose(out2, _reference_forward(x2, params), atol=1e-5, rtol=1e-5)

    # 1-D input path (torch's unsqueeze(0) behavior).
    out3 = jax.block_until_ready(value_net_forward(x[0], params))
    assert out3.shape == (1, 1)
    assert jnp.allclose(out3, ref[:1], atol=1e-5, rtol=1e-5)

    print("KERNEL_OK")
</pallas_src>

<mosaic_0001>
module attributes {stable_mosaic.version = 11 : i64} {
  func.func @_value_net_kernel(%arg0: i32, %arg1: memref<6x128xf32, #tpu.memory_space<vmem>>, %arg2: memref<8x6xf32, #tpu.memory_space<vmem>>, %arg3: memref<8x1xf32, #tpu.memory_space<vmem>>, %arg4: memref<4x8xf32, #tpu.memory_space<vmem>>, %arg5: memref<4x1xf32, #tpu.memory_space<vmem>>, %arg6: memref<1x4xf32, #tpu.memory_space<vmem>>, %arg7: memref<1x1xf32, #tpu.memory_space<vmem>>, %arg8: memref<1x128xf32, #tpu.memory_space<vmem>>) attributes {dimension_semantics = [#tpu.dimension_semantics<parallel>], iteration_bounds = array<i64: 1>, scalar_prefetch = 0 : i64, scratch_operands = 0 : i64, tpu.core_type = #tpu.core_type<tc>, window_params = [{transform_indices = @transform_0, window_bounds = array<i64: 6, 128>}, {pipeline_mode = #tpu.pipeline_mode<synchronous>, transform_indices = @transform_1, window_bounds = array<i64: 8, 6>}, {pipeline_mode = #tpu.pipeline_mode<synchronous>, transform_indices = @transform_2, window_bounds = array<i64: 8, 1>}, {pipeline_mode = #tpu.pipeline_mode<synchronous>, transform_indices = @transform_3, window_bounds = array<i64: 4, 8>}, {pipeline_mode = #tpu.pipeline_mode<synchronous>, transform_indices = @transform_4, window_bounds = array<i64: 4, 1>}, {pipeline_mode = #tpu.pipeline_mode<synchronous>, transform_indices = @transform_5, window_bounds = array<i64: 1, 4>}, {pipeline_mode = #tpu.pipeline_mode<synchronous>, transform_indices = @transform_6, window_bounds = array<i64: 1, 1>}, {transform_indices = @transform_7, window_bounds = array<i64: 1, 128>}]} {
    %c0 = arith.constant 0 : index
    %c0_0 = arith.constant 0 : index
    %0 = vector.load %arg1[%c0, %c0_0] : memref<6x128xf32, #tpu.memory_space<vmem>>, vector<6x128xf32>
    %c0_1 = arith.constant 0 : index
    %c0_2 = arith.constant 0 : index
    %1 = vector.load %arg2[%c0_1, %c0_2] : memref<8x6xf32, #tpu.memory_space<vmem>>, vector<8x6xf32>
    %c0_3 = arith.constant 0 : index
    %c0_4 = arith.constant 0 : index
    %2 = vector.load %arg3[%c0_3, %c0_4] : memref<8x1xf32, #tpu.memory_space<vmem>>, vector<8x1xf32>
    %3 = vector.shape_cast %2 : vector<8x1xf32> to vector<8x1xf32>
    %4 = vector.broadcast %3 : vector<8x1xf32> to vector<8x128xf32>
    %5 = vector.extract_strided_slice %1 {offsets = [0, 0], sizes = [8, 1], strides = [1, 1]} : vector<8x6xf32> to vector<8x1xf32>
    %6 = vector.extract_strided_slice %0 {offsets = [0, 0], sizes = [1, 128], strides = [1, 1]} : vector<6x128xf32> to vector<1x128xf32>
    %7 = vector.broadcast %5 : vector<8x1xf32> to vector<8x128xf32>
    %8 = vector.broadcast %6 : vector<1x128xf32> to vector<8x128xf32>
    %9 = arith.mulf %7, %8 : vector<8x128xf32>
    %10 = arith.addf %4, %9 : vector<8x128xf32>
    %11 = vector.extract_strided_slice %1 {offsets = [0, 1], sizes = [8, 1], strides = [1, 1]} : vector<8x6xf32> to vector<8x1xf32>
    %12 = vector.extract_strided_slice %0 {offsets = [1, 0], sizes = [1, 128], strides = [1, 1]} : vector<6x128xf32> to vector<1x128xf32>
    %13 = vector.broadcast %11 : vector<8x1xf32> to vector<8x128xf32>
    %14 = vector.broadcast %12 : vector<1x128xf32> to vector<8x128xf32>
    %15 = arith.mulf %13, %14 : vector<8x128xf32>
    %16 = arith.addf %10, %15 : vector<8x128xf32>
    %17 = vector.extract_strided_slice %1 {offsets = [0, 2], sizes = [8, 1], strides = [1, 1]} : vector<8x6xf32> to vector<8x1xf32>
    %18 = vector.extract_strided_slice %0 {offsets = [2, 0], sizes = [1, 128], strides = [1, 1]} : vector<6x128xf32> to vector<1x128xf32>
    %19 = vector.broadcast %17 : vector<8x1xf32> to vector<8x128xf32>
    %20 = vector.broadcast %18 : vector<1x128xf32> to vector<8x128xf32>
    %21 = arith.mulf %19, %20 : vector<8x128xf32>
    %22 = arith.addf %16, %21 : vector<8x128xf32>
    %23 = vector.extract_strided_slice %1 {offsets = [0, 3], sizes = [8, 1], strides = [1, 1]} : vector<8x6xf32> to vector<8x1xf32>
    %24 = vector.extract_strided_slice %0 {offsets = [3, 0], sizes = [1, 128], strides = [1, 1]} : vector<6x128xf32> to vector<1x128xf32>
    %25 = vector.broadcast %23 : vector<8x1xf32> to vector<8x128xf32>
    %26 = vector.broadcast %24 : vector<1x128xf32> to vector<8x128xf32>
    %27 = arith.mulf %25, %26 : vector<8x128xf32>
    %28 = arith.addf %22, %27 : vector<8x128xf32>
    %29 = vector.extract_strided_slice %1 {offsets = [0, 4], sizes = [8, 1], strides = [1, 1]} : vector<8x6xf32> to vector<8x1xf32>
    %30 = vector.extract_strided_slice %0 {offsets = [4, 0], sizes = [1, 128], strides = [1, 1]} : vector<6x128xf32> to vector<1x128xf32>
    %31 = vector.broadcast %29 : vector<8x1xf32> to vector<8x128xf32>
    %32 = vector.broadcast %30 : vector<1x128xf32> to vector<8x128xf32>
    %33 = arith.mulf %31, %32 : vector<8x128xf32>
    %34 = arith.addf %28, %33 : vector<8x128xf32>
    %35 = vector.extract_strided_slice %1 {offsets = [0, 5], sizes = [8, 1], strides = [1, 1]} : vector<8x6xf32> to vector<8x1xf32>
    %36 = vector.extract_strided_slice %0 {offsets = [5, 0], sizes = [1, 128], strides = [1, 1]} : vector<6x128xf32> to vector<1x128xf32>
    %37 = vector.broadcast %35 : vector<8x1xf32> to vector<8x128xf32>
    %38 = vector.broadcast %36 : vector<1x128xf32> to vector<8x128xf32>
    %39 = arith.mulf %37, %38 : vector<8x128xf32>
    %40 = arith.addf %34, %39 : vector<8x128xf32>
    %41 = math.tanh %40 : vector<8x128xf32>
    %c0_5 = arith.constant 0 : index
    %c0_6 = arith.constant 0 : index
    %42 = vector.load %arg4[%c0_5, %c0_6] : memref<4x8xf32, #tpu.memory_space<vmem>>, vector<4x8xf32>
    %c0_7 = arith.constant 0 : index
    %c0_8 = arith.constant 0 : index
    %43 = vector.load %arg5[%c0_7, %c0_8] : memref<4x1xf32, #tpu.memory_space<vmem>>, vector<4x1xf32>
    %44 = vector.shape_cast %43 : vector<4x1xf32> to vector<4x1xf32>
    %45 = vector.broadcast %44 : vector<4x1xf32> to vector<4x128xf32>
    %46 = vector.extract_strided_slice %42 {offsets = [0, 0], sizes = [4, 1], strides = [1, 1]} : vector<4x8xf32> to vector<4x1xf32>
    %47 = vector.extract_strided_slice %41 {offsets = [0, 0], sizes = [1, 128], strides = [1, 1]} : vector<8x128xf32> to vector<1x128xf32>
    %48 = vector.broadcast %46 : vector<4x1xf32> to vector<4x128xf32>
    %49 = vector.broadcast %47 : vector<1x128xf32> to vector<4x128xf32>
    %50 = arith.mulf %48, %49 : vector<4x128xf32>
    %51 = arith.addf %45, %50 : vector<4x128xf32>
    %52 = vector.extract_strided_slice %42 {offsets = [0, 1], sizes = [4, 1], strides = [1, 1]} : vector<4x8xf32> to vector<4x1xf32>
    %53 = vector.extract_strided_slice %41 {offsets = [1, 0], sizes = [1, 128], strides = [1, 1]} : vector<8x128xf32> to vector<1x128xf32>
    %54 = vector.broadcast %52 : vector<4x1xf32> to vector<4x128xf32>
    %55 = vector.broadcast %53 : vector<1x128xf32> to vector<4x128xf32>
    %56 = arith.mulf %54, %55 : vector<4x128xf32>
    %57 = arith.addf %51, %56 : vector<4x128xf32>
    %58 = vector.extract_strided_slice %42 {offsets = [0, 2], sizes = [4, 1], strides = [1, 1]} : vector<4x8xf32> to vector<4x1xf32>
    %59 = vector.extract_strided_slice %41 {offsets = [2, 0], sizes = [1, 128], strides = [1, 1]} : vector<8x128xf32> to vector<1x128xf32>
    %60 = vector.broadcast %58 : vector<4x1xf32> to vector<4x128xf32>
    %61 = vector.broadcast %59 : vector<1x128xf32> to vector<4x128xf32>
    %62 = arith.mulf %60, %61 : vector<4x128xf32>
    %63 = arith.addf %57, %62 : vector<4x128xf32>
    %64 = vector.extract_strided_slice %42 {offsets = [0, 3], sizes = [4, 1], strides = [1, 1]} : vector<4x8xf32> to vector<4x1xf32>
    %65 = vector.extract_strided_slice %41 {offsets = [3, 0], sizes = [1, 128], strides = [1, 1]} : vector<8x128xf32> to vector<1x128xf32>
    %66 = vector.broadcast %64 : vector<4x1xf32> to vector<4x128xf32>
    %67 = vector.broadcast %65 : vector<1x128xf32> to vector<4x128xf32>
    %68 = arith.mulf %66, %67 : vector<4x128xf32>
    %69 = arith.addf %63, %68 : vector<4x128xf32>
    %70 = vector.extract_strided_slice %42 {offsets = [0, 4], sizes = [4, 1], strides = [1, 1]} : vector<4x8xf32> to vector<4x1xf32>
    %71 = vector.extract_strided_slice %41 {offsets = [4, 0], sizes = [1, 128], strides = [1, 1]} : vector<8x128xf32> to vector<1x128xf32>
    %72 = vector.broadcast %70 : vector<4x1xf32> to vector<4x128xf32>
    %73 = vector.broadcast %71 : vector<1x128xf32> to vector<4x128xf32>
    %74 = arith.mulf %72, %73 : vector<4x128xf32>
    %75 = arith.addf %69, %74 : vector<4x128xf32>
    %76 = vector.extract_strided_slice %42 {offsets = [0, 5], sizes = [4, 1], strides = [1, 1]} : vector<4x8xf32> to vector<4x1xf32>
    %77 = vector.extract_strided_slice %41 {offsets = [5, 0], sizes = [1, 128], strides = [1, 1]} : vector<8x128xf32> to vector<1x128xf32>
    %78 = vector.broadcast %76 : vector<4x1xf32> to vector<4x128xf32>
    %79 = vector.broadcast %77 : vector<1x128xf32> to vector<4x128xf32>
    %80 = arith.mulf %78, %79 : vector<4x128xf32>
    %81 = arith.addf %75, %80 : vector<4x128xf32>
    %82 = vector.extract_strided_slice %42 {offsets = [0, 6], sizes = [4, 1], strides = [1, 1]} : vector<4x8xf32> to vector<4x1xf32>
    %83 = vector.extract_strided_slice %41 {offsets = [6, 0], sizes = [1, 128], strides = [1, 1]} : vector<8x128xf32> to vector<1x128xf32>
    %84 = vector.broadcast %82 : vector<4x1xf32> to vector<4x128xf32>
    %85 = vector.broadcast %83 : vector<1x128xf32> to vector<4x128xf32>
    %86 = arith.mulf %84, %85 : vector<4x128xf32>
    %87 = arith.addf %81, %86 : vector<4x128xf32>
    %88 = vector.extract_strided_slice %42 {offsets = [0, 7], sizes = [4, 1], strides = [1, 1]} : vector<4x8xf32> to vector<4x1xf32>
    %89 = vector.extract_strided_slice %41 {offsets = [7, 0], sizes = [1, 128], strides = [1, 1]} : vector<8x128xf32> to vector<1x128xf32>
    %90 = vector.broadcast %88 : vector<4x1xf32> to vector<4x128xf32>
    %91 = vector.broadcast %89 : vector<1x128xf32> to vector<4x128xf32>
    %92 = arith.mulf %90, %91 : vector<4x128xf32>
    %93 = arith.addf %87, %92 : vector<4x128xf32>
    %94 = math.tanh %93 : vector<4x128xf32>
    %c0_9 = arith.constant 0 : index
    %c0_10 = arith.constant 0 : index
    %95 = vector.load %arg6[%c0_9, %c0_10] : memref<1x4xf32, #tpu.memory_space<vmem>>, vector<1x4xf32>
    %c0_11 = arith.constant 0 : index
    %c0_12 = arith.constant 0 : index
    %96 = vector.load %arg7[%c0_11, %c0_12] : memref<1x1xf32, #tpu.memory_space<vmem>>, vector<1x1xf32>
    %97 = vector.shape_cast %96 : vector<1x1xf32> to vector<1x1xf32>
    %98 = vector.broadcast %97 : vector<1x1xf32> to vector<1x128xf32>
    %99 = vector.extract_strided_slice %95 {offsets = [0, 0], sizes = [1, 1], strides = [1, 1]} : vector<1x4xf32> to vector<1x1xf32>
    %100 = vector.extract_strided_slice %94 {offsets = [0, 0], sizes = [1, 128], strides = [1, 1]} : vector<4x128xf32> to vector<1x128xf32>
    %101 = vector.broadcast %99 : vector<1x1xf32> to vector<1x128xf32>
    %102 = arith.mulf %101, %100 : vector<1x128xf32>
    %103 = arith.addf %98, %102 : vector<1x128xf32>
    %104 = vector.extract_strided_slice %95 {offsets = [0, 1], sizes = [1, 1], strides = [1, 1]} : vector<1x4xf32> to vector<1x1xf32>
    %105 = vector.extract_strided_slice %94 {offsets = [1, 0], sizes = [1, 128], strides = [1, 1]} : vector<4x128xf32> to vector<1x128xf32>
    %106 = vector.broadcast %104 : vector<1x1xf32> to vector<1x128xf32>
    %107 = arith.mulf %106, %105 : vector<1x128xf32>
    %108 = arith.addf %103, %107 : vector<1x128xf32>
    %109 = vector.extract_strided_slice %95 {offsets = [0, 2], sizes = [1, 1], strides = [1, 1]} : vector<1x4xf32> to vector<1x1xf32>
    %110 = vector.extract_strided_slice %94 {offsets = [2, 0], sizes = [1, 128], strides = [1, 1]} : vector<4x128xf32> to vector<1x128xf32>
    %111 = vector.broadcast %109 : vector<1x1xf32> to vector<1x128xf32>
    %112 = arith.mulf %111, %110 : vector<1x128xf32>
    %113 = arith.addf %108, %112 : vector<1x128xf32>
    %114 = vector.extract_strided_slice %95 {offsets = [0, 3], sizes = [1, 1], strides = [1, 1]} : vector<1x4xf32> to vector<1x1xf32>
    %115 = vector.extract_strided_slice %94 {offsets = [3, 0], sizes = [1, 128], strides = [1, 1]} : vector<4x128xf32> to vector<1x128xf32>
    %116 = vector.broadcast %114 : vector<1x1xf32> to vector<1x128xf32>
    %117 = arith.mulf %116, %115 : vector<1x128xf32>
    %118 = arith.addf %113, %117 : vector<1x128xf32>
    %c0_13 = arith.constant 0 : index
    %c0_14 = arith.constant 0 : index
    %119 = vector.load %arg8[%c0_13, %c0_14] : memref<1x128xf32, #tpu.memory_space<vmem>>, vector<1x128xf32>
    tpu.vector_store %arg8[%c0_13, %c0_14], %118 {strides = array<i32>} : memref<1x128xf32, #tpu.memory_space<vmem>>, vector<1x128xf32>,
    return
  }
  func.func @transform_0(%arg0: i32) -> (i32, i32) {
    %c0_i32 = arith.constant 0 : i32
    %c0_i32_0 = arith.constant 0 : i32
    return %c0_i32, %arg0 : i32, i32
  }
  func.func @transform_1(%arg0: i32) -> (i32, i32) {
    %c0_i32 = arith.constant 0 : i32
    %c0_i32_0 = arith.constant 0 : i32
    %c0_i32_1 = arith.constant 0 : i32
    return %c0_i32, %c0_i32_0 : i32, i32
  }
  func.func @transform_2(%arg0: i32) -> (i32, i32) {
    %c0_i32 = arith.constant 0 : i32
    %c0_i32_0 = arith.constant 0 : i32
    %c0_i32_1 = arith.constant 0 : i32
    return %c0_i32, %c0_i32_0 : i32, i32
  }
  func.func @transform_3(%arg0: i32) -> (i32, i32) {
    %c0_i32 = arith.constant 0 : i32
    %c0_i32_0 = arith.constant 0 : i32
    %c0_i32_1 = arith.constant 0 : i32
    return %c0_i32, %c0_i32_0 : i32, i32
  }
  func.func @transform_4(%arg0: i32) -> (i32, i32) {
    %c0_i32 = arith.constant 0 : i32
    %c0_i32_0 = arith.constant 0 : i32
    %c0_i32_1 = arith.constant 0 : i32
    return %c0_i32, %c0_i32_0 : i32, i32
  }
  func.func @transform_5(%arg0: i32) -> (i32, i32) {
    %c0_i32 = arith.constant 0 : i32
    %c0_i32_0 = arith.constant 0 : i32
    %c0_i32_1 = arith.constant 0 : i32
    return %c0_i32, %c0_i32_0 : i32, i32
  }
  func.func @transform_6(%arg0: i32) -> (i32, i32) {
    %c0_i32 = arith.constant 0 : i32
    %c0_i32_0 = arith.constant 0 : i32
    %c0_i32_1 = arith.constant 0 : i32
    return %c0_i32, %c0_i32_0 : i32, i32
  }
  func.func @transform_7(%arg0: i32) -> (i32, i32) {
    %c0_i32 = arith.constant 0 : i32
    %c0_i32_0 = arith.constant 0 : i32
    return %c0_i32, %arg0 : i32, i32
  }
}

</mosaic_0001>

<bundles_post_ra>
// kernel: tpu_custom_call.1
= control target key start
LH: loop header
LB: loop body
LE: loop exit
PB: predicated region body
PF: predicated region fallthrough
CT: control target
= control target key end

     0   :  { %s412_s0 = inlined_call_operand.vmem [shape: f32[6,128], index: 0, kind: input, shape index: {}]   ;;  %s413_s1 = inlined_call_operand.vmem [shape: f32[8,6], index: 1, kind: input, shape index: {}]   ;;  %s414_s2 = inlined_call_operand.vmem [shape: f32[8,1], index: 2, kind: input, shape index: {}]   ;;  %s415_s3 = inlined_call_operand.vmem [shape: f32[4,8], index: 3, kind: input, shape index: {}]   ;;  %s416_s4 = inlined_call_operand.vmem [shape: f32[4,1], index: 4, kind: input, shape index: {}]   ;;  %s417_s5 = inlined_call_operand.vmem [shape: f32[1,4], index: 5, kind: input, shape index: {}]   ;;  %s418_s6 = inlined_call_operand.<no memory space> [shape: f32[1,1], index: 6, kind: input, shape index: {}]   ;;  %s419_s7 = inlined_call_operand.hbm [shape: f32[1,128], index: 7, kind: output, shape index: {}]  }
   0x1   :  { %v12_v0 = vstv %s418_s6 }
   0x2   :  { %13 = vst [vmem:[#allocation2] sm:$0x1] %v12_v0 }
   0x3   :  { %v30_v1 = vld [vmem:[%s413_s1] sm:$0xff]  ;;  %v320_v2 = vmov 1   ;;  %v321_v3 = vmov 0  }
   0x4   :  { %274 = vset.pattern.permute.xlu1 %v320_v2  ;;  %273 = vset.pattern.permute.xlu0 %v321_v3  ;;  %v31_v4 = vld [vmem:[%s414_s2] sm:$0xff] }
   0x5   :  { %49 = vperm.xlu1 %274, %v30_v1   ;;  %39 = vperm.xlu0 %273, %v30_v1  }
   0x6   :  { %14 = vsyncpa [#allocation4], 0  ;;  %v322_v5 = vmov 2   ;;  %v323_v6 = vmov 3   ;;  %v324_v7 = vmov 4   ;;  %v325_v9 = vmov 5  }
   0x7   :  { %v99_v8 = vld [vmem:[%s415_s3] sm:$0xf]  ;;  %v326_v12 = vmov 6   ;;  %v327_v13 = vmov 7   ;;  %v42_v15 = vlaneseq }
   0x8   :  { %v100_v10 = vld [vmem:[%s416_s4] sm:$0xf] }
   0x9   :  { %275 = vset.pattern.permute.xlu1 %v322_v5  ;;  %34 = vperm.xlu0 %273, %v31_v4   ;;  %v188_v11 = vld [vmem:[%s417_s5] sm:$0x1]  ;;  %v387_v16 = vshrl.u32 %v42_v15, 7 }
   0xa   :  { %59 = vperm.xlu1 %275, %v30_v1   ;;  %v189_v14 = vld [vmem:[#allocation2] sm:$0x1] }
   0xb   :  { %v390_v17 = vsub.s32 0, %v387_v16  ;;  %v29_v18 = vld [vmem:[%s412_s0] sm:$0x3f]  ;;  %v54_v19 = vsub.s32 1, %v387_v16  ;;  %v64_v21 = vsub.s32 2, %v387_v16  ;;  %v74_v27 = vsub.s32 3, %v387_v16 }
   0xc   :  { %v84_v29 = vsub.s32 4, %v387_v16  ;;  %v94_v37 = vsub.s32 5, %v387_v16  ;;  %s328_s0 = smov [#allocation3]  }
   0xd   :  { %276 = vset.pattern.permute.xlu0 %v323_v6  ;;  %v45_v20 = vrot.slane %v29_v18, %v390_v17  ;;  %v55_v24 = vrot.slane %v29_v18, %v54_v19  ;;  %v65_v26 = vrot.slane %v29_v18, %v64_v21  ;;  %v75_v34 = vrot.slane %v29_v18, %v74_v27  ;;  %s256_s5 = sshll.u32 %s328_s0, 4  ;;  %s257_s5 = int_to_ptr.vmem [resolvable:$true] %s256_s5 }
   0xe   :  { %277 = vset.pattern.permute.xlu1 %v324_v7  ;;  %69 = vperm.xlu0 %276, %v30_v1   ;;  %v85_v36 = vrot.slane %v29_v18, %v84_v29  ;;  %v95_v44 = vrot.slane %v29_v18, %v94_v37  ;;  %s298_s10 = scalar_lea.vmem %s257_s5, 16  ;;  %s302_s11 = scalar_lea.vmem %s257_s5, 32 }
   0xf   :  { %79 = vperm.xlu1 %277, %v30_v1   ;;  %p299_p0 = scmp.ne.s32.totalorder %s257_s5, %s298_s10  ;;  %p303_p1 = scmp.lt.s32.totalorder %s257_s5, %s257_s5 }
  0x10   :  { %p304_p2 = scmp.lt.s32.totalorder %s302_s11, %s298_s10 }
  0x12   :  { %279 = vset.pattern.permute.xlu0 %v321_v3  ;;  %p305_p3 = por %p304_p2, %p303_p1 }
  0x13   :  { %278 = vset.pattern.permute.xlu1 %v325_v9  ;;  %108 = vperm.xlu0 %279, %v99_v8  }
  0x14   :  { %89 = vperm.xlu1 %278, %v30_v1   ;;  %p306_p4 = pnand %p305_p3, %p299_p0 }
  0x17   :  { %282 = vset.pattern.permute.xlu0 %v322_v5 }
  0x18   :  { %280 = vset.pattern.permute.xlu1 %v321_v3  ;;  %128 = vperm.xlu0 %282, %v99_v8  }
  0x19   :  { %103 = vperm.xlu1 %280, %v100_v10   ;;  %v183_v10 = vsub.s32 7, %v387_v16 }
  0x1c   :  { %285 = vset.pattern.permute.xlu0 %v325_v9 }
  0x1d   :  { %281 = vset.pattern.permute.xlu1 %v320_v2  ;;  %158 = vperm.xlu0 %285, %v99_v8  }
  0x1e   :  { %118 = vperm.xlu1 %281, %v99_v8  }
  0x21   :  { %288 = vset.pattern.permute.xlu0 %v321_v3 }
  0x22   :  { %283 = vset.pattern.permute.xlu1 %v323_v6  ;;  %201 = vperm.xlu0 %288, %v188_v11  }
  0x23   :  { %138 = vperm.xlu1 %283, %v99_v8  }
  0x26   :  { %291 = vset.pattern.permute.xlu0 %v322_v5 }
  0x27   :  { %284 = vset.pattern.permute.xlu1 %v324_v7  ;;  %224 = vperm.xlu0 %291, %v188_v11  }
  0x28   :  { %148 = vperm.xlu1 %284, %v99_v8  }
  0x2b   :  { %293 = vset.pattern.permute.xlu0 %v323_v6 }
  0x2c   :  { %286 = vset.pattern.permute.xlu1 %v326_v12 }
  0x2d   :  { %168 = vperm.xlu1 %286, %v99_v8  }
  0x31   :  { %287 = vset.pattern.permute.xlu1 %v327_v13 }
  0x32   :  { %178 = vperm.xlu1 %287, %v99_v8  }
  0x36   :  { %289 = vset.pattern.permute.xlu1 %v320_v2 }
  0x37   :  { %211 = vperm.xlu1 %289, %v188_v11  }
  0x3b   :  { %290 = vset.pattern.permute.xlu1 %v321_v3 }
  0x3c   :  { %192 = vperm.xlu1 %290, %v189_v14  }
  0x40   :  { %292 = vset.pattern.permute.xlu1 %v323_v6  ;;  %v173_v6 = vsub.s32 6, %v387_v16 }
  0x41   :  { %237 = vperm.xlu1 %292, %v188_v11  }
  0x80   :  { %v50_v22 = vpop.permute.xlu1 %49  ;;  %v40_v23 = vpop.permute.xlu0 %39 }
  0x81   :  { %v46_v25 = vmul.f32 %v45_v20, %v40_v23  ;;  %v56_v30 = vmul.f32 %v55_v24, %v50_v22 }
  0x84   :  { %v35_v28 = vpop.permute.xlu0 %34 }
  0x85   :  { %v47_v31 = vadd.f32 %v46_v25, %v35_v28  ;;  %v60_v32 = vpop.permute.xlu1 %59 }
  0x86   :  { %v66_v33 = vmul.f32 %v65_v26, %v60_v32 }
  0x87   :  { %v57_v35 = vadd.f32 %v56_v30, %v47_v31 }
  0x89   :  { %v67_v38 = vadd.f32 %v66_v33, %v57_v35  ;;  %v70_v39 = vpop.permute.xlu0 %69 }
  0x8a   :  { %v76_v40 = vmul.f32 %v75_v34, %v70_v39  ;;  %v80_v41 = vpop.permute.xlu1 %79 }
  0x8b   :  { %v86_v43 = vmul.f32 %v85_v36, %v80_v41 }
  0x8c   :  { %v77_v42 = vadd.f32 %v76_v40, %v67_v38 }
  0x8e   :  { %v87_v46 = vadd.f32 %v86_v43, %v77_v42  ;;  %v109_v52 = vpop.permute.xlu0 %108 }
  0x8f   :  { %v90_v45 = vpop.permute.xlu1 %89 }
  0x90   :  { %v96_v47 = vmul.f32 %v95_v44, %v90_v45 }
  0x92   :  { %v97_v48 = vadd.f32 %v96_v47, %v87_v46 }
  0x93   :  { %v129_v59 = vpop.permute.xlu0 %128 }
  0x94   :  { %294 = vtanh.f32 %v97_v48  ;;  %v104_v49 = vpop.permute.xlu1 %103 }
  0x98   :  { %v159_v7 = vpop.permute.xlu0 %158 }
  0x99   :  { %v119_v50 = vpop.permute.xlu1 %118 }
  0x9d   :  { %v202_v24 = vpop.permute.xlu0 %201 }
  0x9e   :  { %v139_v51 = vpop.permute.xlu1 %138 }
  0xa1   :  { %v295_v53 = vpop.eup %294 }
  0xa2   :  { %v124_v54 = vrot.slane %v295_v53, %v54_v19  ;;  %v114_v55 = vrot.slane %v295_v53, %v390_v17  ;;  %v134_v58 = vrot.slane %v295_v53, %v64_v21  ;;  %v144_v62 = vrot.slane %v295_v53, %v74_v27  ;;  %v225_v26 = vpop.permute.xlu0 %224 }
  0xa3   :  { %v149_v56 = vpop.permute.xlu1 %148  ;;  %v154_v1 = vrot.slane %v295_v53, %v84_v29  ;;  %v164_v5 = vrot.slane %v295_v53, %v94_v37  ;;  %v174_v13 = vrot.slane %v295_v53, %v173_v6  ;;  %v184_v19 = vrot.slane %v295_v53, %v183_v10 }
  0xa4   :  { %v115_v57 = vmul.f32 %v114_v55, %v109_v52  ;;  %v125_v60 = vmul.f32 %v124_v54, %v119_v50  ;;  %v135_v0 = vmul.f32 %v134_v58, %v129_v59  ;;  %v145_v3 = vmul.f32 %v144_v62, %v139_v51 }
  0xa5   :  { %v155_v9 = vmul.f32 %v154_v1, %v149_v56  ;;  %v165_v12 = vmul.f32 %v164_v5, %v159_v7  ;;  %v230_v28 = vrot.slane %v225_v26, %v390_v17  ;;  %v207_v29 = vrot.slane %v202_v24, %v390_v17 }
  0xa6   :  { %v116_v61 = vadd.f32 %v115_v57, %v104_v49 }
  0xa8   :  { %v126_v63 = vadd.f32 %v125_v60, %v116_v61  ;;  %v169_v2 = vpop.permute.xlu1 %168 }
  0xa9   :  { %v175_v18 = vmul.f32 %v174_v13, %v169_v2 }
  0xaa   :  { %v136_v4 = vadd.f32 %v135_v0, %v126_v63 }
  0xac   :  { %v146_v8 = vadd.f32 %v145_v3, %v136_v4 }
  0xad   :  { %v179_v14 = vpop.permute.xlu1 %178 }
  0xae   :  { %v156_v11 = vadd.f32 %v155_v9, %v146_v8  ;;  %v185_v21 = vmul.f32 %v184_v19, %v179_v14 }
  0xb0   :  { %v166_v15 = vadd.f32 %v165_v12, %v156_v11 }
  0xb2   :  { %v176_v20 = vadd.f32 %v175_v18, %v166_v15  ;;  %v212_v22 = vpop.permute.xlu1 %211 }
  0xb3   :  { %v217_v16 = vrot.slane %v212_v22, %v390_v17 }
  0xb4   :  { %v186_v23 = vadd.f32 %v185_v21, %v176_v20 }
  0xb6   :  { %296 = vtanh.f32 %v186_v23 }
  0xb7   :  { %v193_v25 = vpop.permute.xlu1 %192 }
  0xb8   :  { %v198_v33 = vrot.slane %v193_v25, %v390_v17 }
  0xbc   :  { %v238_v27 = vpop.permute.xlu1 %237 }
  0xbd   :  { %v243_v30 = vrot.slane %v238_v27, %v390_v17 }
  0xc3   :  { %v297_v31 = vpop.eup %296 }
  0xc4   :  { %v218_v32 = vmul.f32 %v297_v31, %v217_v16  ;;  %v208_v34 = vmul.f32 %v297_v31, %v207_v29  ;;  %v231_v35 = vmul.f32 %v297_v31, %v230_v28  ;;  %v244_v38 = vmul.f32 %v297_v31, %v243_v30 }
  0xc6   :  { %v220_v36 = vrot.slane %v218_v32, 1  ;;  %v209_v37 = vadd.f32 %v208_v34, %v198_v33  ;;  %v233_v39 = vrot.slane %v231_v35, 2  ;;  %v246_v41 = vrot.slane %v244_v38, 3 }
  0xc8   :  { %v222_v40 = vadd.f32 %v220_v36, %v209_v37 }
  0xca   :  { %v235_v42 = vadd.f32 %v233_v39, %v222_v40 }
  0xcc   :  { %v248_v43 = vadd.f32 %v246_v41, %v235_v42 }
  0xce   :  { %249 = vst [vmem:[#allocation3] sm:$0x1] %v248_v43 }
  0xcf   :  { %309 = shalt.err (!%p306_p4)
}
  0xd0   :  { %259 = dma.vmem_to_hbm [thread:$0]  %s257_s5, 16, %s419_s7, [#allocation4]  }
  0xd1   :  { %318 = dma.done.wait [#allocation4], 16  }
  0xd2   :  { %319 = vsyncadd [#allocation4], 4294967280 }
  0xd3   :  { %263 = vsyncpa [#allocation4], 1 }

</bundles_post_ra>
